<compile_context>
chip_gen: v7x
topology: tpu7x:2x2x1
jax: 0.10.0
libtpu: 0.0.40
codegen_flags: <defaults>
</compile_context>

<pallas_src>
import jax
import jax.numpy as jnp
from jax.experimental import pallas as pl
from jax.experimental.pallas import tpu as pltpu


def _rnn_recurrence_kernel(x_ref, wi_ref, wh_ref, bias_ref, o_ref, h_scratch):
    """Fused input-projection + sequential recurrence over one chunk.

    x_ref:     (b_block, t_chunk, input)  f32  -- raw inputs (batch-major)
    wi_ref:    (input,  hidden)           f32  -- W_i2h^T
    wh_ref:    (hidden, hidden)           f32  -- W_h2h^T
    bias_ref:  (1, hidden)                f32  -- b_i2h + b_h2h (folded)
    o_ref:     (b_block, t_chunk, hidden) f32  -- batch-major output
    h_scratch: (b_block, hidden)          f32  -- hidden state carried across chunks
    """
    # Reset the carried hidden state at the first time-chunk of each batch block.
    @pl.when(pl.program_id(1) == 0)
    def _():
        h_scratch[...] = jnp.zeros_like(h_scratch)

    wi = wi_ref[...]
    wh = wh_ref[...]
    bias = bias_ref[...]                       # (1, hidden), broadcasts over batch
    t_chunk = x_ref.shape[1]

    h = h_scratch[...]
    for tt in range(t_chunk):                  # static unroll over the chunk
        x_t = x_ref[:, tt, :]                  # (b_block, input), static load
        pre_t = jnp.dot(x_t, wi, preferred_element_type=jnp.float32) + bias
        hh = jnp.dot(h, wh, preferred_element_type=jnp.float32)
        h = jnp.maximum(pre_t + hh, 0.0)       # ReLU
        o_ref[:, tt, :] = h.astype(o_ref.dtype)
    h_scratch[...] = h


def naive_rnn_forward(inputs, w_i2h, b_i2h, w_h2h, b_h2h, *, t_chunk=16, b_block=None):
    """inputs: (batch, seq_len, input_size); PyTorch-layout weights:
       w_i2h: (hidden, input_size), b_i2h: (hidden,)
       w_h2h: (hidden, hidden),     b_h2h: (hidden,)
    Returns (batch, seq_len, hidden) float32."""
    batch, seq_len, input_size = inputs.shape
    hidden = w_i2h.shape[0]

    if b_block is None:
        b_block = batch
    assert batch % b_block == 0, "b_block must divide batch"
    nb = batch // b_block

    # Pad the time axis to a multiple of the chunk size (padded steps compute
    # garbage hidden state from zero inputs; their outputs are sliced off).
    t_chunk = max(1, min(t_chunk, seq_len))
    n_chunks = pl.cdiv(seq_len, t_chunk)
    padded_seq = n_chunks * t_chunk

    x = inputs.astype(jnp.float32)
    if padded_seq != seq_len:
        x = jnp.pad(x, ((0, 0), (0, padded_seq - seq_len), (0, 0)))

    wi_t = jnp.transpose(w_i2h).astype(jnp.float32)          # (input, hidden)
    wh_t = jnp.transpose(w_h2h).astype(jnp.float32)          # (hidden, hidden)
    bias = (b_i2h + b_h2h).astype(jnp.float32).reshape(1, hidden)

    # Explicit VMEM budget sized to the resident blocks (double-buffered x/out
    # plus the resident weights, bias and hidden-state scratch), with margin.
    f32b = 4
    block_bytes = (
        2 * b_block * t_chunk * input_size * f32b    # x blocks (double-buffered)
        + 2 * b_block * t_chunk * hidden * f32b      # out blocks (double-buffered)
        + input_size * hidden * f32b                 # Wi^T
        + hidden * hidden * f32b                     # Wh^T
        + hidden * f32b                              # bias
        + b_block * hidden * f32b                    # h scratch
    )
    vmem_limit = int(min(max(2 * block_bytes, 16 * 1024 * 1024), 48 * 1024 * 1024))

    out = pl.pallas_call(
        _rnn_recurrence_kernel,
        out_shape=jax.ShapeDtypeStruct((batch, padded_seq, hidden), jnp.float32),
        grid_spec=pltpu.PrefetchScalarGridSpec(
            num_scalar_prefetch=0,
            grid=(nb, n_chunks),
            in_specs=[
                pl.BlockSpec((b_block, t_chunk, input_size), lambda b, c: (b, c, 0)),
                pl.BlockSpec((input_size, hidden), lambda b, c: (0, 0)),
                pl.BlockSpec((hidden, hidden), lambda b, c: (0, 0)),
                pl.BlockSpec((1, hidden), lambda b, c: (0, 0)),
            ],
            out_specs=pl.BlockSpec((b_block, t_chunk, hidden), lambda b, c: (b, c, 0)),
            scratch_shapes=[pltpu.VMEM((b_block, hidden), jnp.float32)],
        ),
        compiler_params=pltpu.CompilerParams(
            # Batch blocks are independent recurrences (megacore-shardable);
            # the time-chunk axis carries the hidden state -> sequential.
            dimension_semantics=("parallel", "arbitrary"),
            vmem_limit_bytes=vmem_limit,
        ),
    )(x, wi_t, wh_t, bias)

    if padded_seq != seq_len:
        out = out[:, :seq_len]
    return out


def _reference_forward(inputs, w_i2h, b_i2h, w_h2h, b_h2h):
    """Pure-JAX f32 reference matching the PyTorch loop exactly."""
    batch, seq_len, _ = inputs.shape
    hidden = w_i2h.shape[0]
    h = jnp.zeros((batch, hidden), jnp.float32)
    outs = []
    for t in range(seq_len):
        x_t = inputs[:, t]
        pre = jnp.dot(x_t, w_i2h.T) + b_i2h
        hh = jnp.dot(h, w_h2h.T) + b_h2h
        h = jnp.maximum(pre + hh, 0.0)
        outs.append(h)
    return jnp.stack(outs, axis=1)  # (batch, seq, hidden)


if __name__ == "__main__":
    batch, seq_len, input_size, hidden_size = 2, 8, 16, 32

    key = jax.random.PRNGKey(0)
    k_x, k_wi, k_bi, k_wh, k_bh = jax.random.split(key, 5)

    # Deterministic parameter init (nn.Linear-like uniform bounds).
    bound_i = 1.0 / jnp.sqrt(input_size)
    bound_h = 1.0 / jnp.sqrt(hidden_size)
    w_i2h = jax.random.uniform(k_wi, (hidden_size, input_size),
                               minval=-bound_i, maxval=bound_i, dtype=jnp.float32)
    b_i2h = jax.random.uniform(k_bi, (hidden_size,),
                               minval=-bound_i, maxval=bound_i, dtype=jnp.float32)
    w_h2h = jax.random.uniform(k_wh, (hidden_size, hidden_size),
                               minval=-bound_h, maxval=bound_h, dtype=jnp.float32)
    b_h2h = jax.random.uniform(k_bh, (hidden_size,),
                               minval=-bound_h, maxval=bound_h, dtype=jnp.float32)

    x = jax.random.normal(k_x, (batch, seq_len, input_size), dtype=jnp.float32)

    y = naive_rnn_forward(x, w_i2h, b_i2h, w_h2h, b_h2h)
    y = jax.block_until_ready(y)

    y_ref = _reference_forward(x, w_i2h, b_i2h, w_h2h, b_h2h)
    assert y.shape == (batch, seq_len, hidden_size)
    assert jnp.allclose(y, y_ref, atol=1e-3, rtol=1e-3), "mismatch vs reference"

    print("KERNEL_OK")
</pallas_src>

<mosaic_0001>
module attributes {stable_mosaic.version = 11 : i64} {
  func.func @_rnn_recurrence_kernel(%arg0: i32, %arg1: i32, %arg2: memref<2x8x16xf32, #tpu.memory_space<vmem>>, %arg3: memref<16x32xf32, #tpu.memory_space<vmem>>, %arg4: memref<32x32xf32, #tpu.memory_space<vmem>>, %arg5: memref<1x32xf32, #tpu.memory_space<vmem>>, %arg6: memref<2x8x32xf32, #tpu.memory_space<vmem>>, %arg7: memref<2x32xf32, #tpu.memory_space<vmem>>) attributes {dimension_semantics = [#tpu.dimension_semantics<parallel>, #tpu.dimension_semantics<arbitrary>], iteration_bounds = array<i64: 1, 1>, scalar_prefetch = 0 : i64, scratch_operands = 1 : i64, tpu.core_type = #tpu.core_type<tc>, window_params = [{transform_indices = @transform_0, window_bounds = array<i64: 2, 8, 16>}, {pipeline_mode = #tpu.pipeline_mode<synchronous>, transform_indices = @transform_1, window_bounds = array<i64: 16, 32>}, {pipeline_mode = #tpu.pipeline_mode<synchronous>, transform_indices = @transform_2, window_bounds = array<i64: 32, 32>}, {pipeline_mode = #tpu.pipeline_mode<synchronous>, transform_indices = @transform_3, window_bounds = array<i64: 1, 32>}, {transform_indices = @transform_4, window_bounds = array<i64: 2, 8, 32>}]} {
    %c0_i32 = arith.constant 0 : i32
    %0 = arith.cmpi eq, %arg1, %c0_i32 : i32
    %1 = arith.extui %0 : i1 to i32
    %c0_i32_0 = arith.constant 0 : i32
    %2 = arith.cmpi ne, %1, %c0_i32_0 : i32
    scf.if %2 {
      %cst_74 = arith.constant 0.000000e+00 : f32
      %104 = vector.broadcast %cst_74 : f32 to vector<2x32xf32>
      %c0_75 = arith.constant 0 : index
      %c0_76 = arith.constant 0 : index
      %105 = vector.load %arg7[%c0_75, %c0_76] : memref<2x32xf32, #tpu.memory_space<vmem>>, vector<2x32xf32>
      tpu.vector_store %arg7[%c0_75, %c0_76], %104 {strides = array<i32>} : memref<2x32xf32, #tpu.memory_space<vmem>>, vector<2x32xf32>,
    } else {
    }
    %c0 = arith.constant 0 : index
    %c0_1 = arith.constant 0 : index
    %3 = vector.load %arg3[%c0, %c0_1] : memref<16x32xf32, #tpu.memory_space<vmem>>, vector<16x32xf32>
    %c0_2 = arith.constant 0 : index
    %c0_3 = arith.constant 0 : index
    %4 = vector.load %arg4[%c0_2, %c0_3] : memref<32x32xf32, #tpu.memory_space<vmem>>, vector<32x32xf32>
    %c0_4 = arith.constant 0 : index
    %c0_5 = arith.constant 0 : index
    %5 = vector.load %arg5[%c0_4, %c0_5] : memref<1x32xf32, #tpu.memory_space<vmem>>, vector<1x32xf32>
    %c0_6 = arith.constant 0 : index
    %c0_7 = arith.constant 0 : index
    %6 = vector.load %arg7[%c0_6, %c0_7] : memref<2x32xf32, #tpu.memory_space<vmem>>, vector<2x32xf32>
    %c0_8 = arith.constant 0 : index
    %c0_9 = arith.constant 0 : index
    %c0_10 = arith.constant 0 : index
    %7 = vector.load %arg2[%c0_8, %c0_9, %c0_10] : memref<2x8x16xf32, #tpu.memory_space<vmem>>, vector<2x1x16xf32>
    %8 = vector.shape_cast %7 : vector<2x1x16xf32> to vector<2x16xf32>
    %cst = arith.constant dense<0.000000e+00> : vector<2x32xf32>
    %9 = tpu.matmul %8, %3, %cst {dimension_numbers = #tpu.dot_dimension_numbers<[1], [0], [0], [1], [0, 0, 1, 1], [], []>} : vector<2x16xf32>, vector<16x32xf32>, vector<2x32xf32> -> vector<2x32xf32>
    %10 = vector.broadcast %5 : vector<1x32xf32> to vector<2x32xf32>
    %11 = arith.addf %9, %10 : vector<2x32xf32>
    %cst_11 = arith.constant dense<0.000000e+00> : vector<2x32xf32>
    %12 = tpu.matmul %6, %4, %cst_11 {dimension_numbers = #tpu.dot_dimension_numbers<[1], [0], [0], [1], [0, 0, 1, 1], [], []>} : vector<2x32xf32>, vector<32x32xf32>, vector<2x32xf32> -> vector<2x32xf32>
    %13 = arith.addf %11, %12 : vector<2x32xf32>
    %cst_12 = arith.constant 0.000000e+00 : f32
    %14 = vector.broadcast %cst_12 : f32 to vector<2x32xf32>
    %15 = arith.maximumf %13, %14 : vector<2x32xf32>
    %c0_13 = arith.constant 0 : index
    %c0_14 = arith.constant 0 : index
    %c0_15 = arith.constant 0 : index
    %16 = vector.load %arg6[%c0_13, %c0_14, %c0_15] : memref<2x8x32xf32, #tpu.memory_space<vmem>>, vector<2x1x32xf32>
    %17 = vector.shape_cast %16 : vector<2x1x32xf32> to vector<2x32xf32>
    %18 = vector.shape_cast %15 : vector<2x32xf32> to vector<2x1x32xf32>
    tpu.vector_store %arg6[%c0_13, %c0_14, %c0_15], %18 {strides = array<i32>} : memref<2x8x32xf32, #tpu.memory_space<vmem>>, vector<2x1x32xf32>,
    %c0_16 = arith.constant 0 : index
    %c1 = arith.constant 1 : index
    %c0_17 = arith.constant 0 : index
    %19 = vector.load %arg2[%c0_16, %c1, %c0_17] : memref<2x8x16xf32, #tpu.memory_space<vmem>>, vector<2x1x16xf32>
    %20 = vector.shape_cast %19 : vector<2x1x16xf32> to vector<2x16xf32>
    %cst_18 = arith.constant dense<0.000000e+00> : vector<2x32xf32>
    %21 = tpu.matmul %20, %3, %cst_18 {dimension_numbers = #tpu.dot_dimension_numbers<[1], [0], [0], [1], [0, 0, 1, 1], [], []>} : vector<2x16xf32>, vector<16x32xf32>, vector<2x32xf32> -> vector<2x32xf32>
    %22 = vector.broadcast %5 : vector<1x32xf32> to vector<2x32xf32>
    %23 = arith.addf %21, %22 : vector<2x32xf32>
    %cst_19 = arith.constant dense<0.000000e+00> : vector<2x32xf32>
    %24 = tpu.matmul %15, %4, %cst_19 {dimension_numbers = #tpu.dot_dimension_numbers<[1], [0], [0], [1], [0, 0, 1, 1], [], []>} : vector<2x32xf32>, vector<32x32xf32>, vector<2x32xf32> -> vector<2x32xf32>
    %25 = arith.addf %23, %24 : vector<2x32xf32>
    %cst_20 = arith.constant 0.000000e+00 : f32
    %26 = vector.broadcast %cst_20 : f32 to vector<2x32xf32>
    %27 = arith.maximumf %25, %26 : vector<2x32xf32>
    %c0_21 = arith.constant 0 : index
    %c1_22 = arith.constant 1 : index
    %c0_23 = arith.constant 0 : index
    %28 = vector.load %arg6[%c0_21, %c1_22, %c0_23] : memref<2x8x32xf32, #tpu.memory_space<vmem>>, vector<2x1x32xf32>
    %29 = vector.shape_cast %28 : vector<2x1x32xf32> to vector<2x32xf32>
    %30 = vector.shape_cast %27 : vector<2x32xf32> to vector<2x1x32xf32>
    tpu.vector_store %arg6[%c0_21, %c1_22, %c0_23], %30 {strides = array<i32>} : memref<2x8x32xf32, #tpu.memory_space<vmem>>, vector<2x1x32xf32>,
    %c0_24 = arith.constant 0 : index
    %c2 = arith.constant 2 : index
    %c0_25 = arith.constant 0 : index
    %31 = vector.load %arg2[%c0_24, %c2, %c0_25] : memref<2x8x16xf32, #tpu.memory_space<vmem>>, vector<2x1x16xf32>
    %32 = vector.shape_cast %31 : vector<2x1x16xf32> to vector<2x16xf32>
    %cst_26 = arith.constant dense<0.000000e+00> : vector<2x32xf32>
    %33 = tpu.matmul %32, %3, %cst_26 {dimension_numbers = #tpu.dot_dimension_numbers<[1], [0], [0], [1], [0, 0, 1, 1], [], []>} : vector<2x16xf32>, vector<16x32xf32>, vector<2x32xf32> -> vector<2x32xf32>
    %34 = vector.broadcast %5 : vector<1x32xf32> to vector<2x32xf32>
    %35 = arith.addf %33, %34 : vector<2x32xf32>
    %cst_27 = arith.constant dense<0.000000e+00> : vector<2x32xf32>
    %36 = tpu.matmul %27, %4, %cst_27 {dimension_numbers = #tpu.dot_dimension_numbers<[1], [0], [0], [1], [0, 0, 1, 1], [], []>} : vector<2x32xf32>, vector<32x32xf32>, vector<2x32xf32> -> vector<2x32xf32>
    %37 = arith.addf %35, %36 : vector<2x32xf32>
    %cst_28 = arith.constant 0.000000e+00 : f32
    %38 = vector.broadcast %cst_28 : f32 to vector<2x32xf32>
    %39 = arith.maximumf %37, %38 : vector<2x32xf32>
    %c0_29 = arith.constant 0 : index
    %c2_30 = arith.constant 2 : index
    %c0_31 = arith.constant 0 : index
    %40 = vector.load %arg6[%c0_29, %c2_30, %c0_31] : memref<2x8x32xf32, #tpu.memory_space<vmem>>, vector<2x1x32xf32>
    %41 = vector.shape_cast %40 : vector<2x1x32xf32> to vector<2x32xf32>
    %42 = vector.shape_cast %39 : vector<2x32xf32> to vector<2x1x32xf32>
    tpu.vector_store %arg6[%c0_29, %c2_30, %c0_31], %42 {strides = array<i32>} : memref<2x8x32xf32, #tpu.memory_space<vmem>>, vector<2x1x32xf32>,
    %c0_32 = arith.constant 0 : index
    %c3 = arith.constant 3 : index
    %c0_33 = arith.constant 0 : index
    %43 = vector.load %arg2[%c0_32, %c3, %c0_33] : memref<2x8x16xf32, #tpu.memory_space<vmem>>, vector<2x1x16xf32>
    %44 = vector.shape_cast %43 : vector<2x1x16xf32> to vector<2x16xf32>
    %cst_34 = arith.constant dense<0.000000e+00> : vector<2x32xf32>
    %45 = tpu.matmul %44, %3, %cst_34 {dimension_numbers = #tpu.dot_dimension_numbers<[1], [0], [0], [1], [0, 0, 1, 1], [], []>} : vector<2x16xf32>, vector<16x32xf32>, vector<2x32xf32> -> vector<2x32xf32>
    %46 = vector.broadcast %5 : vector<1x32xf32> to vector<2x32xf32>
    %47 = arith.addf %45, %46 : vector<2x32xf32>
    %cst_35 = arith.constant dense<0.000000e+00> : vector<2x32xf32>
    %48 = tpu.matmul %39, %4, %cst_35 {dimension_numbers = #tpu.dot_dimension_numbers<[1], [0], [0], [1], [0, 0, 1, 1], [], []>} : vector<2x32xf32>, vector<32x32xf32>, vector<2x32xf32> -> vector<2x32xf32>
    %49 = arith.addf %47, %48 : vector<2x32xf32>
    %cst_36 = arith.constant 0.000000e+00 : f32
    %50 = vector.broadcast %cst_36 : f32 to vector<2x32xf32>
    %51 = arith.maximumf %49, %50 : vector<2x32xf32>
    %c0_37 = arith.constant 0 : index
    %c3_38 = arith.constant 3 : index
    %c0_39 = arith.constant 0 : index
    %52 = vector.load %arg6[%c0_37, %c3_38, %c0_39] : memref<2x8x32xf32, #tpu.memory_space<vmem>>, vector<2x1x32xf32>
    %53 = vector.shape_cast %52 : vector<2x1x32xf32> to vector<2x32xf32>
    %54 = vector.shape_cast %51 : vector<2x32xf32> to vector<2x1x32xf32>
    tpu.vector_store %arg6[%c0_37, %c3_38, %c0_39], %54 {strides = array<i32>} : memref<2x8x32xf32, #tpu.memory_space<vmem>>, vector<2x1x32xf32>,
    %c0_40 = arith.constant 0 : index
    %c4 = arith.constant 4 : index
    %c0_41 = arith.constant 0 : index
    %55 = vector.load %arg2[%c0_40, %c4, %c0_41] : memref<2x8x16xf32, #tpu.memory_space<vmem>>, vector<2x1x16xf32>
    %56 = vector.shape_cast %55 : vector<2x1x16xf32> to vector<2x16xf32>
    %cst_42 = arith.constant dense<0.000000e+00> : vector<2x32xf32>
    %57 = tpu.matmul %56, %3, %cst_42 {dimension_numbers = #tpu.dot_dimension_numbers<[1], [0], [0], [1], [0, 0, 1, 1], [], []>} : vector<2x16xf32>, vector<16x32xf32>, vector<2x32xf32> -> vector<2x32xf32>
    %58 = vector.broadcast %5 : vector<1x32xf32> to vector<2x32xf32>
    %59 = arith.addf %57, %58 : vector<2x32xf32>
    %cst_43 = arith.constant dense<0.000000e+00> : vector<2x32xf32>
    %60 = tpu.matmul %51, %4, %cst_43 {dimension_numbers = #tpu.dot_dimension_numbers<[1], [0], [0], [1], [0, 0, 1, 1], [], []>} : vector<2x32xf32>, vector<32x32xf32>, vector<2x32xf32> -> vector<2x32xf32>
    %61 = arith.addf %59, %60 : vector<2x32xf32>
    %cst_44 = arith.constant 0.000000e+00 : f32
    %62 = vector.broadcast %cst_44 : f32 to vector<2x32xf32>
    %63 = arith.maximumf %61, %62 : vector<2x32xf32>
    %c0_45 = arith.constant 0 : index
    %c4_46 = arith.constant 4 : index
    %c0_47 = arith.constant 0 : index
    %64 = vector.load %arg6[%c0_45, %c4_46, %c0_47] : memref<2x8x32xf32, #tpu.memory_space<vmem>>, vector<2x1x32xf32>
    %65 = vector.shape_cast %64 : vector<2x1x32xf32> to vector<2x32xf32>
    %66 = vector.shape_cast %63 : vector<2x32xf32> to vector<2x1x32xf32>
    tpu.vector_store %arg6[%c0_45, %c4_46, %c0_47], %66 {strides = array<i32>} : memref<2x8x32xf32, #tpu.memory_space<vmem>>, vector<2x1x32xf32>,
    %c0_48 = arith.constant 0 : index
    %c5 = arith.constant 5 : index
    %c0_49 = arith.constant 0 : index
    %67 = vector.load %arg2[%c0_48, %c5, %c0_49] : memref<2x8x16xf32, #tpu.memory_space<vmem>>, vector<2x1x16xf32>
    %68 = vector.shape_cast %67 : vector<2x1x16xf32> to vector<2x16xf32>
    %cst_50 = arith.constant dense<0.000000e+00> : vector<2x32xf32>
    %69 = tpu.matmul %68, %3, %cst_50 {dimension_numbers = #tpu.dot_dimension_numbers<[1], [0], [0], [1], [0, 0, 1, 1], [], []>} : vector<2x16xf32>, vector<16x32xf32>, vector<2x32xf32> -> vector<2x32xf32>
    %70 = vector.broadcast %5 : vector<1x32xf32> to vector<2x32xf32>
    %71 = arith.addf %69, %70 : vector<2x32xf32>
    %cst_51 = arith.constant dense<0.000000e+00> : vector<2x32xf32>
    %72 = tpu.matmul %63, %4, %cst_51 {dimension_numbers = #tpu.dot_dimension_numbers<[1], [0], [0], [1], [0, 0, 1, 1], [], []>} : vector<2x32xf32>, vector<32x32xf32>, vector<2x32xf32> -> vector<2x32xf32>
    %73 = arith.addf %71, %72 : vector<2x32xf32>
    %cst_52 = arith.constant 0.000000e+00 : f32
    %74 = vector.broadcast %cst_52 : f32 to vector<2x32xf32>
    %75 = arith.maximumf %73, %74 : vector<2x32xf32>
    %c0_53 = arith.constant 0 : index
    %c5_54 = arith.constant 5 : index
    %c0_55 = arith.constant 0 : index
    %76 = vector.load %arg6[%c0_53, %c5_54, %c0_55] : memref<2x8x32xf32, #tpu.memory_space<vmem>>, vector<2x1x32xf32>
    %77 = vector.shape_cast %76 : vector<2x1x32xf32> to vector<2x32xf32>
    %78 = vector.shape_cast %75 : vector<2x32xf32> to vector<2x1x32xf32>
    tpu.vector_store %arg6[%c0_53, %c5_54, %c0_55], %78 {strides = array<i32>} : memref<2x8x32xf32, #tpu.memory_space<vmem>>, vector<2x1x32xf32>,
    %c0_56 = arith.constant 0 : index
    %c6 = arith.constant 6 : index
    %c0_57 = arith.constant 0 : index
    %79 = vector.load %arg2[%c0_56, %c6, %c0_57] : memref<2x8x16xf32, #tpu.memory_space<vmem>>, vector<2x1x16xf32>
    %80 = vector.shape_cast %79 : vector<2x1x16xf32> to vector<2x16xf32>
    %cst_58 = arith.constant dense<0.000000e+00> : vector<2x32xf32>
    %81 = tpu.matmul %80, %3, %cst_58 {dimension_numbers = #tpu.dot_dimension_numbers<[1], [0], [0], [1], [0, 0, 1, 1], [], []>} : vector<2x16xf32>, vector<16x32xf32>, vector<2x32xf32> -> vector<2x32xf32>
    %82 = vector.broadcast %5 : vector<1x32xf32> to vector<2x32xf32>
    %83 = arith.addf %81, %82 : vector<2x32xf32>
    %cst_59 = arith.constant dense<0.000000e+00> : vector<2x32xf32>
    %84 = tpu.matmul %75, %4, %cst_59 {dimension_numbers = #tpu.dot_dimension_numbers<[1], [0], [0], [1], [0, 0, 1, 1], [], []>} : vector<2x32xf32>, vector<32x32xf32>, vector<2x32xf32> -> vector<2x32xf32>
    %85 = arith.addf %83, %84 : vector<2x32xf32>
    %cst_60 = arith.constant 0.000000e+00 : f32
    %86 = vector.broadcast %cst_60 : f32 to vector<2x32xf32>
    %87 = arith.maximumf %85, %86 : vector<2x32xf32>
    %c0_61 = arith.constant 0 : index
    %c6_62 = arith.constant 6 : index
    %c0_63 = arith.constant 0 : index
    %88 = vector.load %arg6[%c0_61, %c6_62, %c0_63] : memref<2x8x32xf32, #tpu.memory_space<vmem>>, vector<2x1x32xf32>
    %89 = vector.shape_cast %88 : vector<2x1x32xf32> to vector<2x32xf32>
    %90 = vector.shape_cast %87 : vector<2x32xf32> to vector<2x1x32xf32>
    tpu.vector_store %arg6[%c0_61, %c6_62, %c0_63], %90 {strides = array<i32>} : memref<2x8x32xf32, #tpu.memory_space<vmem>>, vector<2x1x32xf32>,
    %c0_64 = arith.constant 0 : index
    %c7 = arith.constant 7 : index
    %c0_65 = arith.constant 0 : index
    %91 = vector.load %arg2[%c0_64, %c7, %c0_65] : memref<2x8x16xf32, #tpu.memory_space<vmem>>, vector<2x1x16xf32>
    %92 = vector.shape_cast %91 : vector<2x1x16xf32> to vector<2x16xf32>
    %cst_66 = arith.constant dense<0.000000e+00> : vector<2x32xf32>
    %93 = tpu.matmul %92, %3, %cst_66 {dimension_numbers = #tpu.dot_dimension_numbers<[1], [0], [0], [1], [0, 0, 1, 1], [], []>} : vector<2x16xf32>, vector<16x32xf32>, vector<2x32xf32> -> vector<2x32xf32>
    %94 = vector.broadcast %5 : vector<1x32xf32> to vector<2x32xf32>
    %95 = arith.addf %93, %94 : vector<2x32xf32>
    %cst_67 = arith.constant dense<0.000000e+00> : vector<2x32xf32>
    %96 = tpu.matmul %87, %4, %cst_67 {dimension_numbers = #tpu.dot_dimension_numbers<[1], [0], [0], [1], [0, 0, 1, 1], [], []>} : vector<2x32xf32>, vector<32x32xf32>, vector<2x32xf32> -> vector<2x32xf32>
    %97 = arith.addf %95, %96 : vector<2x32xf32>
    %cst_68 = arith.constant 0.000000e+00 : f32
    %98 = vector.broadcast %cst_68 : f32 to vector<2x32xf32>
    %99 = arith.maximumf %97, %98 : vector<2x32xf32>
    %c0_69 = arith.constant 0 : index
    %c7_70 = arith.constant 7 : index
    %c0_71 = arith.constant 0 : index
    %100 = vector.load %arg6[%c0_69, %c7_70, %c0_71] : memref<2x8x32xf32, #tpu.memory_space<vmem>>, vector<2x1x32xf32>
    %101 = vector.shape_cast %100 : vector<2x1x32xf32> to vector<2x32xf32>
    %102 = vector.shape_cast %99 : vector<2x32xf32> to vector<2x1x32xf32>
    tpu.vector_store %arg6[%c0_69, %c7_70, %c0_71], %102 {strides = array<i32>} : memref<2x8x32xf32, #tpu.memory_space<vmem>>, vector<2x1x32xf32>,
    %c0_72 = arith.constant 0 : index
    %c0_73 = arith.constant 0 : index
    %103 = vector.load %arg7[%c0_72, %c0_73] : memref<2x32xf32, #tpu.memory_space<vmem>>, vector<2x32xf32>
    tpu.vector_store %arg7[%c0_72, %c0_73], %99 {strides = array<i32>} : memref<2x32xf32, #tpu.memory_space<vmem>>, vector<2x32xf32>,
    return
  }
  func.func @transform_0(%arg0: i32, %arg1: i32) -> (i32, i32, i32) {
    %c0_i32 = arith.constant 0 : i32
    %c0_i32_0 = arith.constant 0 : i32
    return %arg0, %arg1, %c0_i32 : i32, i32, i32
  }
  func.func @transform_1(%arg0: i32, %arg1: i32) -> (i32, i32) {
    %c0_i32 = arith.constant 0 : i32
    %c0_i32_0 = arith.constant 0 : i32
    %c0_i32_1 = arith.constant 0 : i32
    return %c0_i32, %c0_i32_0 : i32, i32
  }
  func.func @transform_2(%arg0: i32, %arg1: i32) -> (i32, i32) {
    %c0_i32 = arith.constant 0 : i32
    %c0_i32_0 = arith.constant 0 : i32
    %c0_i32_1 = arith.constant 0 : i32
    return %c0_i32, %c0_i32_0 : i32, i32
  }
  func.func @transform_3(%arg0: i32, %arg1: i32) -> (i32, i32) {
    %c0_i32 = arith.constant 0 : i32
    %c0_i32_0 = arith.constant 0 : i32
    %c0_i32_1 = arith.constant 0 : i32
    return %c0_i32, %c0_i32_0 : i32, i32
  }
  func.func @transform_4(%arg0: i32, %arg1: i32) -> (i32, i32, i32) {
    %c0_i32 = arith.constant 0 : i32
    %c0_i32_0 = arith.constant 0 : i32
    return %arg0, %arg1, %c0_i32 : i32, i32, i32
  }
}

</mosaic_0001>

<bundles_post_ra>
// kernel: tpu_custom_call.1
= control target key start
LH: loop header
LB: loop body
LE: loop exit
PB: predicated region body
PF: predicated region fallthrough
CT: control target
= control target key end

     0   :  { %9 = vsyncpa [#allocation4], 0  ;;  %s2231_s0 = inlined_call_operand.hbm [shape: f32[2,8,16], index: 0, kind: input, shape index: {}]   ;;  %s2232_s1 = inlined_call_operand.hbm [shape: f32[16,32], index: 1, kind: input, shape index: {}]   ;;  %s2233_s2 = inlined_call_operand.hbm [shape: f32[32,32], index: 2, kind: input, shape index: {}]   ;;  %s2234_s3 = inlined_call_operand.vmem [shape: f32[1,32], index: 3, kind: input, shape index: {}]   ;;  %s2235_s4 = inlined_call_operand.hbm [shape: f32[2,8,32], index: 4, kind: output, shape index: {}]  }
   0x1   :  { %10 = vsyncpa [#allocation7], 0 }
   0x2   :  { %11 = vsyncpa [#allocation5], 0  ;;  %s1961_s15 = smov [#allocation6]   ;;  %s1962_s17 = smov [#allocation3]  }
   0x3   :  { %s29_s16 = sshll.u32 %s1961_s15, 4  ;;  %s17_s18 = sshll.u32 %s1962_s17, 4  ;;  %s30_s16 = int_to_ptr.vmem [resolvable:$true] %s29_s16  ;;  %s1996_s18 = int_to_ptr.vmem [resolvable:$true] %s17_s18 }
   0x4   :  { %s1867_s21 = scalar_lea.hbm %s2232_s1, 256 }
   0x5   :  { %p1868_p0 = scmp.ne.s32.totalorder %s2232_s1, %s1867_s21  ;;  %p1871_p1 = scmp.lt.u32.totalorder %s1867_s21, %s2232_s1 }
   0x7   :  { %p1873_p2 = pnand %p1871_p1, %p1868_p0 }
   0x9   :  { %1876 = shalt.err (!%p1873_p2)
}
   0xa   :  { %s1877_s26 = scalar_lea.vmem %s30_s16, 256  ;;  %p1882_p4 = scmp.lt.s32.totalorder %s30_s16, %s30_s16 }
   0xb   :  { %p1878_p3 = scmp.ne.s32.totalorder %s30_s16, %s1877_s26  ;;  %p1883_p5 = scmp.lt.s32.totalorder %s1877_s26, %s1877_s26 }
   0xd   :  { %p1884_p6 = por %p1883_p5, %p1882_p4 }
   0xf   :  { %p1885_p7 = pnand %p1884_p6, %p1878_p3 }
  0x11   :  { %1888 = shalt.err (!%p1885_p7)
}
  0x12   :  { %s1963_s27 = smov 128   ;;  %s1964_s28 = smov 8  }
  0x13   :  { %35 = dma.hbm_to_vmem [thread:$0]  %s2232_s1, 256, %s30_s16, [#allocation7], %s1963_s27, %s1963_s27, %s1964_s28  }
  0x14   :  { %s1889_s7 = scalar_lea.hbm %s2231_s0, 256 }
  0x15   :  { %p1890_p8 = scmp.ne.s32.totalorder %s2231_s0, %s1889_s7  ;;  %p1893_p9 = scmp.lt.u32.totalorder %s1889_s7, %s2231_s0 }
  0x17   :  { %p1895_p10 = pnand %p1893_p9, %p1890_p8 }
  0x19   :  { %1898 = shalt.err (!%p1895_p10)
}
  0x1a   :  { %s1899_s12 = scalar_lea.vmem %s1996_s18, 256  ;;  %p1904_p12 = scmp.lt.s32.totalorder %s1996_s18, %s1996_s18 }
  0x1b   :  { %p1900_p11 = scmp.ne.s32.totalorder %s1996_s18, %s1899_s12  ;;  %p1905_p13 = scmp.lt.s32.totalorder %s1899_s12, %s1899_s12 }
  0x1d   :  { %p1906_p0 = por %p1905_p13, %p1904_p12 }
  0x1f   :  { %p1907_p1 = pnand %p1906_p0, %p1900_p11 }
  0x21   :  { %1910 = shalt.err (!%p1907_p1)
}
  0x22   :  { %23 = dma.hbm_to_vmem [thread:$0]  %s2231_s0, 256, %s1996_s18, [#allocation4], %s1963_s27, %s1963_s27, %s1964_s28  }
  0x23   :  { %s1965_s14 = smov [#allocation8]   ;;  %s1911_s19 = scalar_lea.hbm %s2233_s2, 512 }
  0x24   :  { %s41_s15 = sshll.u32 %s1965_s14, 4  ;;  %p1912_p2 = scmp.ne.s32.totalorder %s2233_s2, %s1911_s19  ;;  %s42_s15 = int_to_ptr.vmem [resolvable:$true] %s41_s15 }
  0x25   :  { %p1915_p3 = scmp.lt.u32.totalorder %s1911_s19, %s2233_s2 }
  0x27   :  { %p1917_p4 = pnand %p1915_p3, %p1912_p2 }
  0x29   :  { %1920 = shalt.err (!%p1917_p4)
}
  0x2a   :  { %s1921_s24 = scalar_lea.vmem %s42_s15, 512  ;;  %p1926_p6 = scmp.lt.s32.totalorder %s42_s15, %s42_s15 }
  0x2b   :  { %p1922_p5 = scmp.ne.s32.totalorder %s42_s15, %s1921_s24  ;;  %p1927_p7 = scmp.lt.s32.totalorder %s1921_s24, %s1921_s24 }
  0x2d   :  { %p1928_p8 = por %p1927_p7, %p1926_p6 }
  0x2f   :  { %p1929_p9 = pnand %p1928_p8, %p1922_p5 }
  0x31   :  { %1932 = shalt.err (!%p1929_p9)
}
  0x32   :  { %47 = dma.hbm_to_vmem [thread:$0]  %s2233_s2, 512, %s42_s15, [#allocation7], %s1963_s27, %s1963_s27, %s1964_s28  }
  0x33   :  { %1955 = dma.done.wait [#allocation4], 256  }
  0x34   :  { %1956 = vsyncadd [#allocation4], 4294967040 }
  0x35   :  { %1957 = dma.done.wait [#allocation7], 768  }
  0x36   :  { %1958 = vsyncadd [#allocation7], 4294966528  ;;  %v1966_v0 = vmov 0.0|0.0   ;;  %vm1967_vm0 = vmmov 0   ;;  %v1968_v1 = vmov 0.0   ;;  %vm63_vm1 = vcmask 254976  }
  0x37   :  { %1761 = vmatprep.subr.bf16.mxu0 %v1966_v0  ;;  %1621 = vmatprep.mubr.msk.f32.mxu0 %vm1967_vm0, %v1968_v1  ;;  %64 = vst.msk [vmem:[#allocation2] sm:$0x3] %vm63_vm1, %v1968_v1  ;;  %v65_v2 = vld [vmem:[#allocation6] sm:$0xff]  ;;  %v66_v3 = vld [vmem:[#allocation6 + $0x8] sm:$0xff]  ;;  %v73_v4 = vld [vmem:[#allocation3] sm:$0x1]  ;;  %v239_v26 = vlaneseq }
  0x38   :  { %1770 = vmatprep.subr.bf16.mxu1 %v1966_v0  ;;  %1639 = vmatprep.mubr.msk.f32.mxu1 %vm1967_vm0, %v1968_v1  ;;  %v2056_v5 = vpack.c.bf16 %v66_v3, %v65_v2  ;;  %v74_v6 = vld [vmem:[#allocation3 + $0x8] sm:$0x1]  ;;  %vm84_vm2 = vcmask 1041409   ;;  %v67_v7 = vld [vmem:[#allocation8] sm:$0xff]  ;;  %vm86_vm3 = vcmask 130048   ;;  %v69_v14 = vld [vmem:[#allocation8 + $0x10] sm:$0xff] }
  0x39   :  { %v68_v8 = vld [vmem:[#allocation8 + $0x8] sm:$0xff]  ;;  %v83_v9 = vrot.slane %v74_v6, 7  ;;  %v263_v11 = vld [vmem:[#allocation3 + $0x1] sm:$0x1]  ;;  %v70_v15 = vld [vmem:[#allocation8 + $0x18] sm:$0xff]  ;;  %vm159_vm4 = vcmask 261120  }
  0x3a   :  { %1763 = vmatpush3.bf16.msra.mxu0 %v2056_v5  ;;  %v2059_v10 = vpack.c.bf16 %v68_v8, %v67_v7  ;;  %1772 = vmatpush3.bf16.msra.mxu1 %v2056_v5  ;;  %v264_v12 = vld [vmem:[#allocation3 + $0x9] sm:$0x1]  ;;  %v2068_v18 = vpack.c.bf16 %v70_v15, %v69_v14  ;;  %v442_v20 = vld [vmem:[#allocation3 + $0x2] sm:$0x1]  ;;  %v443_v21 = vld [vmem:[#allocation3 + $0xa] sm:$0x1] }
  0x3b   :  { %v85_v13 = vsel %vm84_vm2, %v83_v9, %v73_v4  ;;  %1764 = vmatprep.subr.bf16.mxu0 %v1966_v0  ;;  %v267_v16 = vrot.slane %v264_v12, 7  ;;  %1773 = vmatprep.subr.bf16.mxu1 %v1966_v0  ;;  %v446_v22 = vrot.slane %v443_v21, 7  ;;  %v1969_v24 = vmov 1966171168   ;;  %v2098_v29 = vld [vmem:[%s2234_s3] ss:$0 sm:$0xff] }
  0x3c   :  { %v237_v25 = vunpack.c.l.s4 %v1969_v24  ;;  %v240_v28 = vshrl.u32 %v239_v26, 7  ;;  %vm260_vm5 = vcmask 253952   ;;  %v621_v39 = vld [vmem:[#allocation3 + $0x3] sm:$0x1]  ;;  %v622_v40 = vld [vmem:[#allocation3 + $0xb] sm:$0x1] }
  0x3d   :  { %1622 = vmatmul.mubr.msk.f32.vlgmr.msra.gmra.mrb[0].mxu0 %vm86_vm3, %v85_v13  ;;  %v268_v17 = vsel %vm84_vm2, %v267_v16, %v263_v11  ;;  %v447_v23 = vsel %vm84_vm2, %v446_v22, %v442_v20  ;;  %v625_v41 = vrot.slane %v622_v40, 7  ;;  %v800_v51 = vld [vmem:[#allocation3 + $0x4] sm:$0x1]  ;;  %v801_v52 = vld [vmem:[#allocation3 + $0xc] sm:$0x1]  ;;  %s1970_s3 = smov [#allocation9]  }
  0x3e   :  { %1766 = vmatpush3.bf16.msra.mxu0 %v2059_v10  ;;  %1632 = vmatprep.mubr.msk.f32.mxu0 %vm1967_vm0, %v1968_v1  ;;  %v72_v19 = vld [vmem:[#allocation2] sm:$0x3]  ;;  %v238_v27 = vunpack.c.0.s8 %v237_v25  ;;  %v804_v53 = vrot.slane %v801_v52, 7  ;;  %v979_v63 = vld [vmem:[#allocation3 + $0x5] sm:$0x1]  ;;  %s1523_s26 = sshll.u32 %s1970_s3, 4  ;;  %s1524_s26 = int_to_ptr.vmem [resolvable:$true] %s1523_s26 }
  0x3f   :  { %1767 = vmatprep.subr.bf16.mxu0 %v1966_v0  ;;  %1640 = vmatmul.mubr.msk.f32.vlgmr.msra.gmra.mrb[0].mxu1 %vm86_vm3, %v268_v17  ;;  %v626_v42 = vsel %vm84_vm2, %v625_v41, %v621_v39  ;;  %v980_v2 = vld [vmem:[#allocation3 + $0xd] sm:$0x1]  ;;  %v1158_v15 = vld [vmem:[#allocation3 + $0x6] sm:$0x1]  ;;  %v1159_v16 = vld [vmem:[#allocation3 + $0xe] sm:$0x1]  ;;  %p1938_p11 = scmp.lt.s32.totalorder %s1524_s26, %s1524_s26 }
  0x40   :  { %1775 = vmatpush3.bf16.msra.mxu1 %v2059_v10  ;;  %1650 = vmatprep.mubr.msk.f32.mxu1 %vm1967_vm0, %v1968_v1  ;;  %v2101_v32 = vsub.s32 %v238_v27, %v240_v28  ;;  %v805_v54 = vsel %vm84_vm2, %v804_v53, %v800_v51  ;;  %v983_v3 = vrot.slane %v980_v2, 7  ;;  %v1162_v17 = vrot.slane %v1159_v16, 7  ;;  %v1337_v28 = vld [vmem:[#allocation3 + $0x7] sm:$0x1]  ;;  %s1933_s29 = scalar_lea.vmem %s1524_s26, 256 }
  0x41   :  { %1776 = vmatprep.subr.bf16.mxu1 %v1966_v0  ;;  %p1934_p10 = scmp.ne.s32.totalorder %s1524_s26, %s1933_s29  ;;  %p1939_p12 = scmp.lt.s32.totalorder %s1933_s29, %s1933_s29 }
  0x42   :  { %1769 = vmatpush3.bf16.msra.mxu0 %v2068_v18  ;;  %v984_v4 = vsel %vm84_vm2, %v983_v3, %v979_v63 }
  0x43   :  { %1779 = vmatprep.subr.bf16.mxu0 %v1966_v0  ;;  %p1940_p13 = por %p1939_p12, %p1938_p11 }
  0x44   :  { %1778 = vmatpush3.bf16.msra.mxu1 %v2068_v18 }
  0x45   :  { %1633 = vmatmul.mubr.msk.f32.vlgmr.msra.gmra.mrb[0].mxu0 %vm159_vm4, %v72_v19  ;;  %1788 = vmatprep.subr.bf16.mxu1 %v1966_v0  ;;  %v1163_v19 = vsel %vm84_vm2, %v1162_v17, %v1158_v15  ;;  %p1941_p0 = pnand %p1940_p13, %p1934_p10 }
  0x46   :  { %1781 = vmatpush3.bf16.msra.mxu0 %v2056_v5  ;;  %1657 = vmatprep.mubr.msk.f32.mxu0 %vm1967_vm0, %v1968_v1 }
  0x47   :  { %1782 = vmatprep.subr.bf16.mxu0 %v1966_v0 }
  0x49   :  { %1658 = vmatmul.mubr.msk.f32.vlgmr.msra.gmra.mrb[2].mxu0 %vm86_vm3, %v447_v23 }
  0x4a   :  { %1784 = vmatpush3.bf16.msra.mxu0 %v2059_v10  ;;  %1668 = vmatprep.mubr.msk.f32.mxu0 %vm1967_vm0, %v1968_v1 }
  0x4b   :  { %1785 = vmatprep.subr.bf16.mxu0 %v1966_v0 }
  0x4e   :  { %1787 = vmatpush3.bf16.msra.mxu0 %v2068_v18 }
  0x4f   :  { %1797 = vmatprep.subr.bf16.mxu0 %v1966_v0 }
 0x118   :  { %v229_v30 = vpop.f32.mrb[0].mxu0 }
 0x119   :  { %v1833_v31 = vadd.f32 %v2098_v29, %v229_v30  ;;  %v1634_v33 = vpop.f32.mrb[1].mxu0  ;;  %v1338_v30 = vld [vmem:[#allocation3 + $0xf] sm:$0x1] }
 0x11b   :  { %v234_v34 = vmax.f32 %v1833_v31, 0.0  ;;  %v1341_v31 = vrot.slane %v1338_v30, 7 }
 0x11d   :  { %v242_v35 = vrot.slane %v234_v34, %v2101_v32  ;;  %1651 = vmatmul.mubr.msk.f32.vlgmr.msra.gmra.mrb[0].mxu1 %vm159_vm4, %v234_v34  ;;  %v1342_v33 = vsel %vm84_vm2, %v1341_v31, %v1337_v28 }
 0x11e   :  { %1790 = vmatpush3.bf16.msra.mxu1 %v2056_v5  ;;  %1675 = vmatprep.mubr.msk.f32.mxu1 %vm1967_vm0, %v1968_v1 }
 0x11f   :  { %v243_v36 = vcombine.high %v242_v35, %v242_v35  ;;  %v250_v37 = vrot.slane %v242_v35, %v2101_v32  ;;  %1791 = vmatprep.subr.bf16.mxu1 %v1966_v0 }
 0x121   :  { %v257_v38 = vrot.slane %v243_v36, %v2101_v32  ;;  %261 = vst.msk [vmem:[#allocation9] sm:$0x1] %vm260_vm5, %v250_v37  ;;  %1676 = vmatmul.mubr.msk.f32.vlgmr.msra.gmra.mrb[2].mxu1 %vm86_vm3, %v626_v42 }
 0x122   :  { %1793 = vmatpush3.bf16.msra.mxu1 %v2059_v10  ;;  %1686 = vmatprep.mubr.msk.f32.mxu1 %vm1967_vm0, %v1968_v1 }
 0x123   :  { %262 = vst.msk [vmem:[#allocation9 + $0x8] sm:$0x1] %vm260_vm5, %v257_v38  ;;  %1794 = vmatprep.subr.bf16.mxu1 %v1966_v0 }
 0x126   :  { %1796 = vmatpush3.bf16.msra.mxu1 %v2068_v18 }
 0x127   :  { %1806 = vmatprep.subr.bf16.mxu1 %v1966_v0 }
 0x1f0   :  { %v409_v43 = vpop.f32.mrb[0].mxu1 }
 0x1f1   :  { %v1834_v44 = vadd.f32 %v2098_v29, %v409_v43  ;;  %v1652_v45 = vpop.f32.mrb[1].mxu1 }
 0x1f3   :  { %v414_v46 = vmax.f32 %v1834_v44, 0.0 }
 0x1f5   :  { %v422_v47 = vrot.slane %v414_v46, %v2101_v32  ;;  %1669 = vmatmul.mubr.msk.f32.vlgmr.msra.gmra.mrb[2].mxu0 %vm159_vm4, %v414_v46 }
 0x1f6   :  { %1799 = vmatpush3.bf16.msra.mxu0 %v2056_v5  ;;  %1693 = vmatprep.mubr.msk.f32.mxu0 %vm1967_vm0, %v1968_v1 }
 0x1f7   :  { %v423_v48 = vcombine.high %v422_v47, %v422_v47  ;;  %v430_v49 = vrot.slane %v422_v47, %v2101_v32  ;;  %1800 = vmatprep.subr.bf16.mxu0 %v1966_v0 }
 0x1f9   :  { %v437_v50 = vrot.slane %v423_v48, %v2101_v32  ;;  %440 = vst.msk [vmem:[#allocation9 + $0x1] sm:$0x1] %vm260_vm5, %v430_v49  ;;  %1694 = vmatmul.mubr.msk.f32.vlgmr.msra.gmra.mrb[4].mxu0 %vm86_vm3, %v805_v54 }
 0x1fa   :  { %1802 = vmatpush3.bf16.msra.mxu0 %v2059_v10  ;;  %1704 = vmatprep.mubr.msk.f32.mxu0 %vm1967_vm0, %v1968_v1 }
 0x1fb   :  { %441 = vst.msk [vmem:[#allocation9 + $0x9] sm:$0x1] %vm260_vm5, %v437_v50  ;;  %1803 = vmatprep.subr.bf16.mxu0 %v1966_v0 }
 0x1fe   :  { %1805 = vmatpush3.bf16.msra.mxu0 %v2068_v18 }
 0x1ff   :  { %1815 = vmatprep.subr.bf16.mxu0 %v1966_v0 }
 0x2c8   :  { %v588_v55 = vpop.f32.mrb[2].mxu0 }
 0x2c9   :  { %v1835_v56 = vadd.f32 %v2098_v29, %v588_v55  ;;  %v1670_v57 = vpop.f32.mrb[3].mxu0 }
 0x2cb   :  { %v593_v58 = vmax.f32 %v1835_v56, 0.0 }
 0x2cd   :  { %v601_v59 = vrot.slane %v593_v58, %v2101_v32  ;;  %1687 = vmatmul.mubr.msk.f32.vlgmr.msra.gmra.mrb[2].mxu1 %vm159_vm4, %v593_v58 }
 0x2ce   :  { %1808 = vmatpush3.bf16.msra.mxu1 %v2056_v5  ;;  %1711 = vmatprep.mubr.msk.f32.mxu1 %vm1967_vm0, %v1968_v1 }
 0x2cf   :  { %v602_v60 = vcombine.high %v601_v59, %v601_v59  ;;  %v609_v61 = vrot.slane %v601_v59, %v2101_v32  ;;  %1809 = vmatprep.subr.bf16.mxu1 %v1966_v0 }
 0x2d1   :  { %v616_v62 = vrot.slane %v602_v60, %v2101_v32  ;;  %619 = vst.msk [vmem:[#allocation9 + $0x2] sm:$0x1] %vm260_vm5, %v609_v61  ;;  %1712 = vmatmul.mubr.msk.f32.vlgmr.msra.gmra.mrb[4].mxu1 %vm86_vm3, %v984_v4 }
 0x2d2   :  { %1811 = vmatpush3.bf16.msra.mxu1 %v2059_v10  ;;  %1722 = vmatprep.mubr.msk.f32.mxu1 %vm1967_vm0, %v1968_v1 }
 0x2d3   :  { %620 = vst.msk [vmem:[#allocation9 + $0xa] sm:$0x1] %vm260_vm5, %v616_v62  ;;  %1812 = vmatprep.subr.bf16.mxu1 %v1966_v0 }
 0x2d6   :  { %1814 = vmatpush3.bf16.msra.mxu1 %v2068_v18 }
 0x2d7   :  { %1824 = vmatprep.subr.bf16.mxu1 %v1966_v0 }
 0x3a0   :  { %v767_v6 = vpop.f32.mrb[2].mxu1 }
 0x3a1   :  { %v1836_v7 = vadd.f32 %v2098_v29, %v767_v6  ;;  %v1688_v8 = vpop.f32.mrb[3].mxu1 }
 0x3a3   :  { %v772_v9 = vmax.f32 %v1836_v7, 0.0 }
 0x3a5   :  { %v780_v11 = vrot.slane %v772_v9, %v2101_v32  ;;  %1705 = vmatmul.mubr.msk.f32.vlgmr.msra.gmra.mrb[4].mxu0 %vm159_vm4, %v772_v9 }
 0x3a6   :  { %1817 = vmatpush3.bf16.msra.mxu0 %v2056_v5  ;;  %1729 = vmatprep.mubr.msk.f32.mxu0 %vm1967_vm0, %v1968_v1 }
 0x3a7   :  { %v781_v12 = vcombine.high %v780_v11, %v780_v11  ;;  %v788_v13 = vrot.slane %v780_v11, %v2101_v32  ;;  %1818 = vmatprep.subr.bf16.mxu0 %v1966_v0 }
 0x3a9   :  { %v795_v14 = vrot.slane %v781_v12, %v2101_v32  ;;  %798 = vst.msk [vmem:[#allocation9 + $0x3] sm:$0x1] %vm260_vm5, %v788_v13  ;;  %1730 = vmatmul.mubr.msk.f32.vlgmr.msra.gmra.mrb[6].mxu0 %vm86_vm3, %v1163_v19 }
 0x3aa   :  { %1820 = vmatpush3.bf16.msra.mxu0 %v2059_v10  ;;  %1740 = vmatprep.mubr.msk.f32.mxu0 %vm1967_vm0, %v1968_v1 }
 0x3ab   :  { %799 = vst.msk [vmem:[#allocation9 + $0xb] sm:$0x1] %vm260_vm5, %v795_v14  ;;  %1821 = vmatprep.subr.bf16.mxu0 %v1966_v0 }
 0x3ae   :  { %1823 = vmatpush3.bf16.msra.mxu0 %v2068_v18 }
 0x478   :  { %v946_v20 = vpop.f32.mrb[4].mxu0 }
 0x479   :  { %v1837_v21 = vadd.f32 %v2098_v29, %v946_v20  ;;  %v1706_v22 = vpop.f32.mrb[5].mxu0 }
 0x47b   :  { %v951_v23 = vmax.f32 %v1837_v21, 0.0 }
 0x47d   :  { %v959_v24 = vrot.slane %v951_v23, %v2101_v32  ;;  %1723 = vmatmul.mubr.msk.f32.vlgmr.msra.gmra.mrb[4].mxu1 %vm159_vm4, %v951_v23 }
 0x47e   :  { %1826 = vmatpush3.bf16.msra.mxu1 %v2056_v5  ;;  %1747 = vmatprep.mubr.msk.f32.mxu1 %vm1967_vm0, %v1968_v1 }
 0x47f   :  { %v960_v25 = vcombine.high %v959_v24, %v959_v24  ;;  %v967_v26 = vrot.slane %v959_v24, %v2101_v32  ;;  %1827 = vmatprep.subr.bf16.mxu1 %v1966_v0 }
 0x481   :  { %v974_v27 = vrot.slane %v960_v25, %v2101_v32  ;;  %977 = vst.msk [vmem:[#allocation9 + $0x4] sm:$0x1] %vm260_vm5, %v967_v26  ;;  %1748 = vmatmul.mubr.msk.f32.vlgmr.msra.gmra.mrb[6].mxu1 %vm86_vm3, %v1342_v33 }
 0x482   :  { %1829 = vmatpush3.bf16.msra.mxu1 %v2059_v10  ;;  %1758 = vmatprep.mubr.msk.f32.mxu1 %vm1967_vm0, %v1968_v1 }
 0x483   :  { %978 = vst.msk [vmem:[#allocation9 + $0xc] sm:$0x1] %vm260_vm5, %v974_v27  ;;  %1830 = vmatprep.subr.bf16.mxu1 %v1966_v0 }
 0x486   :  { %1832 = vmatpush3.bf16.msra.mxu1 %v2068_v18 }
 0x550   :  { %v1125_v5 = vpop.f32.mrb[4].mxu1 }
 0x551   :  { %v1838_v34 = vadd.f32 %v2098_v29, %v1125_v5  ;;  %v1724_v35 = vpop.f32.mrb[5].mxu1 }
 0x553   :  { %v1130_v36 = vmax.f32 %v1838_v34, 0.0 }
 0x555   :  { %v1138_v37 = vrot.slane %v1130_v36, %v2101_v32  ;;  %1741 = vmatmul.mubr.msk.f32.vlgmr.msra.gmra.mrb[6].mxu0 %vm159_vm4, %v1130_v36 }
 0x557   :  { %v1139_v38 = vcombine.high %v1138_v37, %v1138_v37  ;;  %v1146_v39 = vrot.slane %v1138_v37, %v2101_v32 }
 0x559   :  { %v1153_v10 = vrot.slane %v1139_v38, %v2101_v32  ;;  %1156 = vst.msk [vmem:[#allocation9 + $0x5] sm:$0x1] %vm260_vm5, %v1146_v39 }
 0x55b   :  { %1157 = vst.msk [vmem:[#allocation9 + $0xd] sm:$0x1] %vm260_vm5, %v1153_v10 }
 0x628   :  { %v1304_v0 = vpop.f32.mrb[6].mxu0 }
 0x629   :  { %v1839_v1 = vadd.f32 %v2098_v29, %v1304_v0  ;;  %v1742_v18 = vpop.f32.mrb[7].mxu0 }
 0x62b   :  { %v1309_v40 = vmax.f32 %v1839_v1, 0.0 }
 0x62d   :  { %v1317_v41 = vrot.slane %v1309_v40, %v2101_v32  ;;  %1759 = vmatmul.mubr.msk.f32.vlgmr.msra.gmra.mrb[6].mxu1 %vm159_vm4, %v1309_v40 }
 0x62f   :  { %v1318_v42 = vcombine.high %v1317_v41, %v1317_v41  ;;  %v1325_v43 = vrot.slane %v1317_v41, %v2101_v32 }
 0x631   :  { %v1332_v44 = vrot.slane %v1318_v42, %v2101_v32  ;;  %1335 = vst.msk [vmem:[#allocation9 + $0x6] sm:$0x1] %vm260_vm5, %v1325_v43 }
 0x633   :  { %1336 = vst.msk [vmem:[#allocation9 + $0xe] sm:$0x1] %vm260_vm5, %v1332_v44 }
 0x700   :  { %v1483_v45 = vpop.f32.mrb[6].mxu1 }
 0x701   :  { %v1840_v46 = vadd.f32 %v2098_v29, %v1483_v45  ;;  %v1760_v47 = vpop.f32.mrb[7].mxu1 }
 0x703   :  { %v1488_v48 = vmax.f32 %v1840_v46, 0.0 }
 0x705   :  { %v1496_v49 = vrot.slane %v1488_v48, %v2101_v32  ;;  %1517 = vst.msk [vmem:[#allocation2] sm:$0x3] %vm63_vm1, %v1488_v48 }
 0x707   :  { %v1497_v50 = vcombine.high %v1496_v49, %v1496_v49  ;;  %v1504_v51 = vrot.slane %v1496_v49, %v2101_v32 }
 0x709   :  { %v1511_v52 = vrot.slane %v1497_v50, %v2101_v32  ;;  %1514 = vst.msk [vmem:[#allocation9 + $0x7] sm:$0x1] %vm260_vm5, %v1504_v51 }
 0x70b   :  { %1515 = vst.msk [vmem:[#allocation9 + $0xf] sm:$0x1] %vm260_vm5, %v1511_v52 }
 0x70c   :  { %1944 = shalt.err (!%p1941_p0)
}
 0x70d   :  { %s1945_s6 = scalar_lea.hbm %s2235_s4, 256 }
 0x70e   :  { %p1946_p1 = scmp.ne.s32.totalorder %s2235_s4, %s1945_s6  ;;  %p1949_p2 = scmp.lt.u32.totalorder %s1945_s6, %s2235_s4 }
 0x710   :  { %p1951_p3 = pnand %p1949_p2, %p1946_p1 }
 0x712   :  { %1954 = shalt.err (!%p1951_p3)
}
 0x713   :  { %1529 = dma.vmem_to_hbm [thread:$0]  %s1524_s26, 256, %s2235_s4, [#allocation5], %s1963_s27, %s1963_s27, %s1964_s28  }
 0x714   :  { %1959 = dma.done.wait [#allocation5], 256  }
 0x715   :  { %1960 = vsyncadd [#allocation5], 4294967040 }
 0x716   :  { %1533 = vsyncpa [#allocation4], 1 }
 0x717   :  { %1534 = vsyncpa [#allocation7], 1 }
 0x718   :  { %1535 = vsyncpa [#allocation5], 1 }

</bundles_post_ra>
